<compile_context>
chip_gen: v5e
topology: v5e:2x2
jax: 0.10.0
libtpu: 0.0.40
codegen_flags: <defaults>
</compile_context>

<pallas_src>
import functools

import jax
import jax.numpy as jnp
from jax.experimental import pallas as pl
from jax.experimental.pallas import tpu as pltpu


_TILE_VMEM_BUDGET_BYTES = 16 * 1024 * 1024  # target for the pipeline's double buffers


def _round_up(x: int, m: int) -> int:
    return ((x + m - 1) // m) * m


def _padded_tile_bytes(tn, T, Ds, De, in_isz, out_isz, emb_isz):
    """Worst-case VMEM for one grid step's pipeline buffers (double-buffered),
    covering both the lane-dense (primary) and padded 4-D (fallback) layouts."""
    Dout = Ds + De
    tn8 = _round_up(max(tn, 1), 8)
    t8 = _round_up(T, 8)
    # lane-dense layout: last two dims (TN, T*D) pad to (8-mult, 128-mult)
    in_dense = tn8 * _round_up(T * Ds, 128) * in_isz
    out_dense = tn8 * _round_up(T * Dout, 128) * out_isz
    # padded 4-D layout: per object a (T, D) tile pads to (8-mult, 128)
    in_pad = tn * t8 * 128 * in_isz
    out_pad = tn * t8 * 128 * out_isz
    emb = tn8 * _round_up(De, 128) * emb_isz
    return 2 * (max(in_dense + out_dense, in_pad + out_pad) + emb)


def _choose_tile_n(N, T, Ds, De, in_isz, out_isz, emb_isz,
                   budget=_TILE_VMEM_BUDGET_BYTES):
    """Largest N-tile within the VMEM budget.  TN must be a multiple of 8 unless it
    equals N (BlockSpec (8, 128) rule on the 2-D/3-D blocks where TN is sublanes)."""
    if N <= 8 or _padded_tile_bytes(N, T, Ds, De, in_isz, out_isz, emb_isz) <= budget:
        return N
    best, cand = 8, 16
    while cand < N:
        if _padded_tile_bytes(cand, T, Ds, De, in_isz, out_isz, emb_isz) <= budget:
            best = cand
            cand += 8
        else:
            break
    return best


# ----------------------------------------------------------------------------
# Primary kernel: lane-dense layout.
# ----------------------------------------------------------------------------
def _lane_dense_kernel(states_ref, emb_ref, out_ref, *, T, Ds, De, out_dtype):
    # states_ref: (1, TN, T*Ds)       lane-dense slab for the current (n-tile, batch)
    # emb_ref:    (TN, De)            embedding rows of this n-tile (resident across batch sweep)
    # out_ref:    (1, TN, T*(Ds+De))  lane-dense output slab
    e = emb_ref[...].astype(out_dtype)                  # (TN, De)
    pieces = []
    for t in range(T):  # static unroll; T is a known, modest compile-time constant
        s_t = states_ref[0, :, t * Ds:(t + 1) * Ds]     # (TN, Ds) static lane slice
        pieces.append(s_t.astype(out_dtype))
        pieces.append(e)                                # reuse == implicit time broadcast
    row = jnp.concatenate(pieces, axis=-1)              # (TN, T*(Ds+De)) built in vregs
    out_ref[0, :, :] = row                              # single lane-dense store


def _call_lane_dense(states, emb_table, tile_n, out_dtype, vmem_limit, cost):
    B, N, T, Ds = states.shape
    De = emb_table.shape[-1]
    Dout = Ds + De
    num_nt = pl.cdiv(N, tile_n)
    kernel = functools.partial(_lane_dense_kernel, T=T, Ds=Ds, De=De, out_dtype=out_dtype)
    states_flat = states.reshape(B, N, T * Ds)          # contiguous -> free reshape
    out_flat = pl.pallas_call(
        kernel,
        out_shape=jax.ShapeDtypeStruct((B, N, T * Dout), out_dtype),
        grid_spec=pltpu.PrefetchScalarGridSpec(
            num_scalar_prefetch=0,
            # batch innermost -> the embedding tile's block index is constant across
            # it and is not re-DMA'd per step.
            grid=(num_nt, B),
            in_specs=[
                pl.BlockSpec((1, tile_n, T * Ds), lambda nt, b: (b, nt, 0)),
                pl.BlockSpec((tile_n, De), lambda nt, b: (nt, 0)),
            ],
            out_specs=pl.BlockSpec((1, tile_n, T * Dout), lambda nt, b: (b, nt, 0)),
        ),
        compiler_params=pltpu.CompilerParams(
            dimension_semantics=("parallel", "parallel"),
            vmem_limit_bytes=vmem_limit,
        ),
        cost_estimate=cost,
    )(states_flat, emb_table)
    return out_flat.reshape(B, N, T, Dout)


# ----------------------------------------------------------------------------
# Fallback kernel: previously-validated padded 4-D layout, now N-tiled.
# ----------------------------------------------------------------------------
def _padded_kernel(states_ref, emb_ref, out_ref):
    # states_ref: (1, TN, T, Ds); emb_ref: (TN, De); out_ref: (1, TN, T, Ds + De)
    s = states_ref[...]
    e = emb_ref[...]
    _, tn, T, _ = s.shape
    De = e.shape[-1]
    e_b = jnp.broadcast_to(e[None, :, None, :], (1, tn, T, De))
    out_ref[...] = jnp.concatenate(
        [s.astype(out_ref.dtype), e_b.astype(out_ref.dtype)], axis=-1)


def _call_padded(states, emb_table, tile_n, out_dtype, vmem_limit, cost):
    B, N, T, Ds = states.shape
    De = emb_table.shape[-1]
    Dout = Ds + De
    num_nt = pl.cdiv(N, tile_n)
    return pl.pallas_call(
        _padded_kernel,
        out_shape=jax.ShapeDtypeStruct((B, N, T, Dout), out_dtype),
        grid_spec=pltpu.PrefetchScalarGridSpec(
            num_scalar_prefetch=0,
            grid=(num_nt, B),
            in_specs=[
                pl.BlockSpec((1, tile_n, T, Ds), lambda nt, b: (b, nt, 0, 0)),
                pl.BlockSpec((tile_n, De), lambda nt, b: (nt, 0)),
            ],
            out_specs=pl.BlockSpec((1, tile_n, T, Dout), lambda nt, b: (b, nt, 0, 0)),
        ),
        compiler_params=pltpu.CompilerParams(
            dimension_semantics=("parallel", "parallel"),
            vmem_limit_bytes=vmem_limit,
        ),
        cost_estimate=cost,
    )(states, emb_table)


# ----------------------------------------------------------------------------
# Wrappers.
# ----------------------------------------------------------------------------
def node_id_forward_pallas(states, emb_table):
    """Pallas implementation of NodeID.forward.

    states: (B, N, T, Ds); emb_table: (N, De)  ->  (B, N, T, Ds + De)
    """
    B, N, T, Ds = states.shape
    N_e, De = emb_table.shape
    assert N_e == N, "embedding table rows must equal n_objects"
    out_dtype = jnp.result_type(states.dtype, emb_table.dtype)

    in_isz = jnp.dtype(states.dtype).itemsize
    out_isz = jnp.dtype(out_dtype).itemsize
    emb_isz = jnp.dtype(emb_table.dtype).itemsize
    tile_n = _choose_tile_n(N, T, Ds, De, in_isz, out_isz, emb_isz)
    tile_bytes = _padded_tile_bytes(tile_n, T, Ds, De, in_isz, out_isz, emb_isz)
    # Raise the scoped VMEM limit enough for the chosen tiles (+ headroom), but stay
    # well under v7x's 64 MiB physical VMEM.
    vmem_limit = int(min(max(tile_bytes + (8 << 20), 32 << 20), 48 << 20))

    bytes_accessed = (states.size * in_isz
                      + emb_table.size * emb_isz
                      + B * N * T * (Ds + De) * out_isz)
    cost = pl.CostEstimate(flops=0, transcendentals=0,
                           bytes_accessed=int(bytes_accessed))

    try:
        out = _call_lane_dense(states, emb_table, tile_n, out_dtype, vmem_limit, cost)
        return jax.block_until_ready(out)   # surface compile/runtime errors inside the try
    except Exception:
        # TODO(synk): the lane-dense interleave relies on unaligned static lane slices
        # plus a many-operand concatenate; if Mosaic rejects that lowering for some
        # shape, degrade to the previously-validated padded 4-D layout (still N-tiled).
        out = _call_padded(states, emb_table, tile_n, out_dtype, vmem_limit, cost)
        return jax.block_until_ready(out)


def node_id_forward(states, emb_table, *, min_pallas_out_elements=1 << 20):
    """NodeID.forward.  For tiny problems the per-pallas_call / per-grid-step overhead
    dominates and XLA's fused concatenate is already at HBM roofline, so use it; use
    the Pallas kernel for production-sized inputs."""
    B, N, T, Ds = states.shape
    De = emb_table.shape[-1]
    out_dtype = jnp.result_type(states.dtype, emb_table.dtype)
    if B * N * T * (Ds + De) < min_pallas_out_elements:
        emb_b = jnp.broadcast_to(emb_table[None, :, None, :], (B, N, T, De))
        return jnp.concatenate(
            [states.astype(out_dtype), emb_b.astype(out_dtype)], axis=-1)
    return node_id_forward_pallas(states, emb_table)


if __name__ == "__main__":
    # Small shapes consistent with the module's forward:
    #   states: (batch, n_objects, time, state_dim)
    B, N_OBJ, T, STATE_DIM = 2, 5, 8, 4
    OBJ_ID_DIM = 8

    key = jax.random.PRNGKey(0)
    k_states, k_emb = jax.random.split(key)
    states = jax.random.normal(k_states, (B, N_OBJ, T, STATE_DIM), dtype=jnp.float32)
    # Deterministic "nn.Embedding" weight init (normal(0, 1), like PyTorch default).
    emb_table = jax.random.normal(k_emb, (N_OBJ, OBJ_ID_DIM), dtype=jnp.float32)

    # Force the Pallas path even at demo sizes so the kernel itself is exercised.
    out = node_id_forward_pallas(states, emb_table)
    out = jax.block_until_ready(out)

    # Reference (same semantics as the PyTorch forward).
    emb_b = jnp.broadcast_to(emb_table[None, :, None, :], (B, N_OBJ, T, OBJ_ID_DIM))
    ref = jnp.concatenate([states, emb_b], axis=-1)
    assert out.shape == (B, N_OBJ, T, STATE_DIM + OBJ_ID_DIM)
    assert jnp.allclose(out, ref), "mismatch vs reference (pallas path)"

    # Size-gated public wrapper (falls back to XLA concat at these tiny shapes).
    out2 = jax.block_until_ready(node_id_forward(states, emb_table))
    assert jnp.allclose(out2, ref), "mismatch vs reference (gated path)"

    print("KERNEL_OK")
</pallas_src>

<mosaic_0001>
module attributes {stable_mosaic.version = 11 : i64} {
  func.func @_lane_dense_kernel(%arg0: i32, %arg1: i32, %arg2: memref<1x5x32xf32, #tpu.memory_space<vmem>>, %arg3: memref<5x8xf32, #tpu.memory_space<vmem>>, %arg4: memref<1x5x96xf32, #tpu.memory_space<vmem>>) attributes {dimension_semantics = [#tpu.dimension_semantics<parallel>, #tpu.dimension_semantics<parallel>], iteration_bounds = array<i64: 1, 2>, scalar_prefetch = 0 : i64, scratch_operands = 0 : i64, tpu.core_type = #tpu.core_type<tc>, window_params = [{transform_indices = @transform_0, window_bounds = array<i64: 1, 5, 32>}, {transform_indices = @transform_1, window_bounds = array<i64: 5, 8>}, {transform_indices = @transform_2, window_bounds = array<i64: 1, 5, 96>}]} {
    %c0 = arith.constant 0 : index
    %c0_0 = arith.constant 0 : index
    %0 = vector.load %arg3[%c0, %c0_0] : memref<5x8xf32, #tpu.memory_space<vmem>>, vector<5x8xf32>
    %c0_1 = arith.constant 0 : index
    %c0_2 = arith.constant 0 : index
    %c0_3 = arith.constant 0 : index
    %1 = vector.load %arg2[%c0_1, %c0_2, %c0_3] : memref<1x5x32xf32, #tpu.memory_space<vmem>>, vector<1x5x4xf32>
    %2 = vector.shape_cast %1 : vector<1x5x4xf32> to vector<5x4xf32>
    %c0_4 = arith.constant 0 : index
    %c0_5 = arith.constant 0 : index
    %c4 = arith.constant 4 : index
    %3 = vector.load %arg2[%c0_4, %c0_5, %c4] : memref<1x5x32xf32, #tpu.memory_space<vmem>>, vector<1x5x4xf32>
    %4 = vector.shape_cast %3 : vector<1x5x4xf32> to vector<5x4xf32>
    %c0_6 = arith.constant 0 : index
    %c0_7 = arith.constant 0 : index
    %c8 = arith.constant 8 : index
    %5 = vector.load %arg2[%c0_6, %c0_7, %c8] : memref<1x5x32xf32, #tpu.memory_space<vmem>>, vector<1x5x4xf32>
    %6 = vector.shape_cast %5 : vector<1x5x4xf32> to vector<5x4xf32>
    %c0_8 = arith.constant 0 : index
    %c0_9 = arith.constant 0 : index
    %c12 = arith.constant 12 : index
    %7 = vector.load %arg2[%c0_8, %c0_9, %c12] : memref<1x5x32xf32, #tpu.memory_space<vmem>>, vector<1x5x4xf32>
    %8 = vector.shape_cast %7 : vector<1x5x4xf32> to vector<5x4xf32>
    %c0_10 = arith.constant 0 : index
    %c0_11 = arith.constant 0 : index
    %c16 = arith.constant 16 : index
    %9 = vector.load %arg2[%c0_10, %c0_11, %c16] : memref<1x5x32xf32, #tpu.memory_space<vmem>>, vector<1x5x4xf32>
    %10 = vector.shape_cast %9 : vector<1x5x4xf32> to vector<5x4xf32>
    %c0_12 = arith.constant 0 : index
    %c0_13 = arith.constant 0 : index
    %c20 = arith.constant 20 : index
    %11 = vector.load %arg2[%c0_12, %c0_13, %c20] : memref<1x5x32xf32, #tpu.memory_space<vmem>>, vector<1x5x4xf32>
    %12 = vector.shape_cast %11 : vector<1x5x4xf32> to vector<5x4xf32>
    %c0_14 = arith.constant 0 : index
    %c0_15 = arith.constant 0 : index
    %c24 = arith.constant 24 : index
    %13 = vector.load %arg2[%c0_14, %c0_15, %c24] : memref<1x5x32xf32, #tpu.memory_space<vmem>>, vector<1x5x4xf32>
    %14 = vector.shape_cast %13 : vector<1x5x4xf32> to vector<5x4xf32>
    %c0_16 = arith.constant 0 : index
    %c0_17 = arith.constant 0 : index
    %c28 = arith.constant 28 : index
    %15 = vector.load %arg2[%c0_16, %c0_17, %c28] : memref<1x5x32xf32, #tpu.memory_space<vmem>>, vector<1x5x4xf32>
    %16 = vector.shape_cast %15 : vector<1x5x4xf32> to vector<5x4xf32>
    %17 = tpu.concatenate %2, %0, %4, %0, %6, %0, %8, %0, %10, %0, %12, %0, %14, %0, %16, %0 in 1 : vector<5x4xf32>, vector<5x8xf32>, vector<5x4xf32>, vector<5x8xf32>, vector<5x4xf32>, vector<5x8xf32>, vector<5x4xf32>, vector<5x8xf32>, vector<5x4xf32>, vector<5x8xf32>, vector<5x4xf32>, vector<5x8xf32>, vector<5x4xf32>, vector<5x8xf32>, vector<5x4xf32>, vector<5x8xf32> -> vector<5x96xf32>
    %c0_18 = arith.constant 0 : index
    %c0_19 = arith.constant 0 : index
    %c0_20 = arith.constant 0 : index
    %18 = vector.load %arg4[%c0_18, %c0_19, %c0_20] : memref<1x5x96xf32, #tpu.memory_space<vmem>>, vector<1x5x96xf32>
    %19 = vector.shape_cast %18 : vector<1x5x96xf32> to vector<5x96xf32>
    %20 = vector.shape_cast %17 : vector<5x96xf32> to vector<1x5x96xf32>
    tpu.vector_store %arg4[%c0_18, %c0_19, %c0_20], %20 {strides = array<i32>} : memref<1x5x96xf32, #tpu.memory_space<vmem>>, vector<1x5x96xf32>,
    return
  }
  func.func @transform_0(%arg0: i32, %arg1: i32) -> (i32, i32, i32) {
    %c0_i32 = arith.constant 0 : i32
    %c0_i32_0 = arith.constant 0 : i32
    return %arg1, %arg0, %c0_i32 : i32, i32, i32
  }
  func.func @transform_1(%arg0: i32, %arg1: i32) -> (i32, i32) {
    %c0_i32 = arith.constant 0 : i32
    %c0_i32_0 = arith.constant 0 : i32
    return %arg0, %c0_i32 : i32, i32
  }
  func.func @transform_2(%arg0: i32, %arg1: i32) -> (i32, i32, i32) {
    %c0_i32 = arith.constant 0 : i32
    %c0_i32_0 = arith.constant 0 : i32
    return %arg1, %arg0, %c0_i32 : i32, i32, i32
  }
}

module attributes {stable_mosaic.version = 11 : i64} {
  func.func @_padded_kernel(%arg0: i32, %arg1: i32, %arg2: memref<1x5x8x4xf32, #tpu.memory_space<vmem>>, %arg3: memref<5x8xf32, #tpu.memory_space<vmem>>, %arg4: memref<1x5x8x12xf32, #tpu.memory_space<vmem>>) attributes {dimension_semantics = [#tpu.dimension_semantics<parallel>, #tpu.dimension_semantics<parallel>], iteration_bounds = array<i64: 1, 2>, scalar_prefetch = 0 : i64, scratch_operands = 0 : i64, tpu.core_type = #tpu.core_type<tc>, window_params = [{transform_indices = @transform_0, window_bounds = array<i64: 1, 5, 8, 4>}, {transform_indices = @transform_1, window_bounds = array<i64: 5, 8>}, {transform_indices = @transform_2, window_bounds = array<i64: 1, 5, 8, 12>}]} {
    %c0 = arith.constant 0 : index
    %c0_0 = arith.constant 0 : index
    %c0_1 = arith.constant 0 : index
    %c0_2 = arith.constant 0 : index
    %0 = vector.load %arg2[%c0, %c0_0, %c0_1, %c0_2] : memref<1x5x8x4xf32, #tpu.memory_space<vmem>>, vector<1x5x8x4xf32>
    %c0_3 = arith.constant 0 : index
    %c0_4 = arith.constant 0 : index
    %1 = vector.load %arg3[%c0_3, %c0_4] : memref<5x8xf32, #tpu.memory_space<vmem>>, vector<5x8xf32>
    %2 = vector.shape_cast %1 : vector<5x8xf32> to vector<1x5x1x8xf32>
    %3 = vector.shape_cast %2 : vector<1x5x1x8xf32> to vector<1x5x1x8xf32>
    %4 = vector.broadcast %3 : vector<1x5x1x8xf32> to vector<1x5x8x8xf32>
    %5 = tpu.concatenate %0, %4 in 3 : vector<1x5x8x4xf32>, vector<1x5x8x8xf32> -> vector<1x5x8x12xf32>
    %c0_5 = arith.constant 0 : index
    %c0_6 = arith.constant 0 : index
    %c0_7 = arith.constant 0 : index
    %c0_8 = arith.constant 0 : index
    %6 = vector.load %arg4[%c0_5, %c0_6, %c0_7, %c0_8] : memref<1x5x8x12xf32, #tpu.memory_space<vmem>>, vector<1x5x8x12xf32>
    tpu.vector_store %arg4[%c0_5, %c0_6, %c0_7, %c0_8], %5 {strides = array<i32>} : memref<1x5x8x12xf32, #tpu.memory_space<vmem>>, vector<1x5x8x12xf32>,
    return
  }
  func.func @transform_0(%arg0: i32, %arg1: i32) -> (i32, i32, i32, i32) {
    %c0_i32 = arith.constant 0 : i32
    %c0_i32_0 = arith.constant 0 : i32
    %c0_i32_1 = arith.constant 0 : i32
    return %arg1, %arg0, %c0_i32, %c0_i32_0 : i32, i32, i32, i32
  }
  func.func @transform_1(%arg0: i32, %arg1: i32) -> (i32, i32) {
    %c0_i32 = arith.constant 0 : i32
    %c0_i32_0 = arith.constant 0 : i32
    return %arg0, %c0_i32 : i32, i32
  }
  func.func @transform_2(%arg0: i32, %arg1: i32) -> (i32, i32, i32, i32) {
    %c0_i32 = arith.constant 0 : i32
    %c0_i32_0 = arith.constant 0 : i32
    %c0_i32_1 = arith.constant 0 : i32
    return %arg1, %arg0, %c0_i32, %c0_i32_0 : i32, i32, i32, i32
  }
}

</mosaic_0001>

<bundles_post_ra>
// kernel: tpu_custom_call.1
= control target key start
LH: loop header
LB: loop body
LE: loop exit
PB: predicated region body
PF: predicated region fallthrough
CT: control target
= control target key end

     0   :  { %s457_s9 = smov 0   ;;  %s459_s10 = smov 0   ;;  %s500_s0 = inlined_call_operand.vmem [shape: f32[2,5,32], index: 0, kind: input, shape index: {}]   ;;  %s501_s1 = inlined_call_operand.vmem [shape: f32[5,8], index: 1, kind: input, shape index: {}]   ;;  %s502_s2 = inlined_call_operand.vmem [shape: f32[2,5,96], index: 2, kind: output, shape index: {}]  }
   0x1   :  { %s461_s11 = smov 0  }
   0x2 LB: > { %s21_s12 = sadd.s32 1, %s423_s10  ;;  %p363_p0 = scmp.ge.s32.totalorder %s427_s11, 1  ;;  %s427_s11 = sphi %s461_s11, %s12_s11   ;;  %s423_s10 = sphi %s459_s10, %s504_s10   ;;  %s419_s9 = sphi %s457_s9, %s503_s9  }
   0x3   : > { %p22_p1 = scmp.ge.s32.totalorder %s21_s12, 2  ;;  %p139_p2 = scmp.lt.s32.totalorder %s427_s11, 3 }
   0x5   : > { %s506_s12 = smov (%p22_p1, %s21_s12), 0  ;;  %p140_p3 = pnand %p363_p0, %p139_p2 }
   0x6   : > { %s429_s15 = smov (!%p140_p3), 4   ;;  %s430_s16 = smov (!%p140_p3), 16  }
   0x7   : > { %143 = sbr.rel (%p140_p3) target bundleno = 164 (0xa4), region = 28  ;;  %p169_p4 = scmp.lt.s32.totalorder (!%p140_p3), %s419_s9, 1 }
   0x8   : > { %s431_s18 = smov (!%p140_p3), 28   ;;  %s432_s22 = smov (!%p140_p3), 8  }
   0x9   : > { %s433_s23 = smov (!%p140_p3), 24   ;;  %s434_s24 = smov (!%p140_p3), 40  }
   0xa   : > { %s435_s25 = smov (!%p140_p3), 32   ;;  %s436_s26 = smov (!%p140_p3), 52  }
   0xb   : > { %s437_s27 = smov (!%p140_p3), 64   ;;  %s438_s28 = smov (!%p140_p3), 48  }
   0xc   : > { %v187_v0 = vld [vmem:[%s501_s1] sm:$0x1f]  ;;  %s508_s9 = smov (!%p169_p4, %s419_s9), 1  ;;  %s439_s29 = smov 76   ;;  %vm236_vm0 = vcmask 31744   ;;  %vm238_vm1 = vcmask 97280  }
   0xd   : > { %190 = vrot.lane.b32.xlu0 %v187_v0, %s429_s15  ;;  %197 = vrot.lane.b32.xlu1 %v187_v0, %s430_s16  ;;  %s364_s17 = sshll.u32 %s508_s9, 3  ;;  %s440_s30 = smov 56   ;;  %vm240_vm2 = vcmask 130048   ;;  %vm242_vm3 = vcmask 195584   ;;  %vm244_vm4 = vcmask 228352   ;;  %vm246_vm5 = vcmask 293888  }
   0xe   : > { %203 = vrot.lane.b32.xlu2 %v187_v0, %s431_s18  ;;  %s175_s21 = scalar_lea.vmem %s500_s0, %s364_s17  ;;  %s441_s3 = smov 88   ;;  %vm248_vm6 = vcmask 326656   ;;  %vm250_vm7 = vcmask 392192   ;;  %vm252_vm8 = vcmask 424960   ;;  %vm254_vm9 = vcmask 490496  }
   0xf   : > { %v188_v1 = vld [vmem:[%s175_s21] sm:$0x1f]  ;;  %vm256_vm10 = vcmask 523264   ;;  %vm258_vm11 = vcmask 588800   ;;  %vm260_vm12 = vcmask 621568   ;;  %vm262_vm13 = vcmask 687104   ;;  %s186_s6 = scalar_lea.vmem %s502_s2, %s364_s17 }
  0x10   : > { %vm264_vm14 = vcmask 719872   ;;  %vm266_vm15 = vcmask 782336  }
  0x15   : > { %194 = vrot.lane.b32.xlu0 %v188_v1, %s432_s22  ;;  %200 = vrot.lane.b32.xlu1 %v188_v1, %s430_s16 }
  0x16   : > { %206 = vrot.lane.b32.xlu2 %v188_v1, %s433_s23 }
  0x1d   : > { %209 = vrot.lane.b32.xlu0 %v187_v0, %s434_s24  ;;  %212 = vrot.lane.b32.xlu1 %v188_v1, %s435_s25 }
  0x1e   : > { %215 = vrot.lane.b32.xlu2 %v187_v0, %s436_s26 }
  0x25   : > { %218 = vrot.lane.b32.xlu0 %v188_v1, %s434_s24  ;;  %221 = vrot.lane.b32.xlu1 %v187_v0, %s437_s27 }
  0x26   : > { %224 = vrot.lane.b32.xlu2 %v188_v1, %s438_s28 }
  0x2d   : > { %227 = vrot.lane.b32.xlu0 %v187_v0, %s439_s29  ;;  %230 = vrot.lane.b32.xlu1 %v188_v1, %s440_s30 }
  0x2e   : > { %233 = vrot.lane.b32.xlu2 %v187_v0, %s441_s3 }
  0x68   : > { %v204_v2 = vpop.permute.xlu2 %203 }
  0x70   : > { %v207_v5 = vpop.permute.xlu2 %206 }
  0x78   : > { %v216_v11 = vpop.permute.xlu2 %215 }
  0x7f   : > { %v191_v3 = vpop.permute.xlu0 %190  ;;  %v198_v4 = vpop.permute.xlu1 %197 }
  0x80   : > { %v237_v6 = vsel %vm236_vm0, %v188_v1, %v191_v3  ;;  %v225_v18 = vpop.permute.xlu2 %224 }
  0x87   : > { %v195_v7 = vpop.permute.xlu0 %194  ;;  %v201_v8 = vpop.permute.xlu1 %200 }
  0x88   : > { %v239_v9 = vsel %vm238_vm1, %v237_v6, %v195_v7  ;;  %v234_v25 = vpop.permute.xlu2 %233 }
  0x89   : > { %v241_v10 = vsel %vm240_vm2, %v239_v9, %v198_v4 }
  0x8a   : > { %v243_v12 = vsel %vm242_vm3, %v241_v10, %v201_v8 }
  0x8b   : > { %v245_v13 = vsel %vm244_vm4, %v243_v12, %v204_v2 }
  0x8c   : > { %v247_v16 = vsel %vm246_vm5, %v245_v13, %v207_v5 }
  0x8f   : > { %v210_v14 = vpop.permute.xlu0 %209  ;;  %v213_v15 = vpop.permute.xlu1 %212 }
  0x90   : > { %v249_v17 = vsel %vm248_vm6, %v247_v16, %v210_v14 }
  0x91   : > { %v251_v19 = vsel %vm250_vm7, %v249_v17, %v213_v15 }
  0x92   : > { %v253_v22 = vsel %vm252_vm8, %v251_v19, %v216_v11 }
  0x97   : > { %v219_v20 = vpop.permute.xlu0 %218  ;;  %v222_v21 = vpop.permute.xlu1 %221 }
  0x98   : > { %v255_v23 = vsel %vm254_vm9, %v253_v22, %v219_v20 }
  0x99   : > { %v257_v24 = vsel %vm256_vm10, %v255_v23, %v222_v21 }
  0x9a   : > { %v259_v26 = vsel %vm258_vm11, %v257_v24, %v225_v18 }
  0x9f   : > { %v228_v27 = vpop.permute.xlu0 %227  ;;  %v231_v28 = vpop.permute.xlu1 %230 }
  0xa0   : > { %v261_v29 = vsel %vm260_vm12, %v259_v26, %v228_v27 }
  0xa1   : > { %v263_v30 = vsel %vm262_vm13, %v261_v29, %v231_v28 }
  0xa2   : > { %v265_v31 = vsel %vm264_vm14, %v263_v30, %v234_v25 }
  0xa3   : > { %267 = vst.msk [vmem:[%s186_s6] sm:$0x1f] %vm266_vm15, %v265_v31 }
  0xa4 PF: > { %s12_s11 = sadd.s32 1, %s427_s11   ;;  %s503_s9 = smov %s423_s10 }
  0xa5   : > { %p9_p5 = scmp.ge.s32.totalorder %s12_s11, 4   ;;  %s504_s10 = smov %s506_s12 }
  0xa7   :  { %11 = sbr.rel (!%p9_p5) target bundleno = 2 (0x2), region = 61 }

// kernel: tpu_custom_call.1
= control target key start
LH: loop header
LB: loop body
LE: loop exit
PB: predicated region body
PF: predicated region fallthrough
CT: control target
= control target key end

     0   :  { %7 = vsyncpa [#allocation3], 0  ;;  %s628_s0 = inlined_call_operand.vmem [shape: f32[2,5,8,4], index: 0, kind: input, shape index: {}]   ;;  %s629_s1 = inlined_call_operand.vmem [shape: f32[5,8], index: 1, kind: input, shape index: {}]   ;;  %s630_s2 = inlined_call_operand.hbm [shape: f32[2,5,8,12], index: 2, kind: output, shape index: {}]  }
   0x1   :  { %9 = vsyncpa [#allocation3 + $0x1], 0  ;;  %s514_s9 = smov 0   ;;  %s516_s10 = smov 0  }
   0x2   :  { %s518_s11 = smov 0   ;;  %s520_s12 = smov 0  }
   0x3   :  { %s522_s13 = smov 0   ;;  %s524_s14 = smov 0  }
   0x4 LB: > { %s345_s15 = sadd.s32 4294967295, %s494_s14   ;;  %s346_s16 = sadd.s32 4294967294, %s494_s14   ;;  %s494_s14 = sphi %s524_s14, %s15_s14   ;;  %s490_s13 = sphi %s522_s13, %s637_s13   ;;  %s486_s12 = sphi %s520_s12, %s636_s12   ;;  %s482_s11 = sphi %s518_s11, %s635_s11   ;;  %s478_s10 = sphi %s516_s10, %s634_s10   ;;  %s474_s9 = sphi %s514_s9, %s633_s9  }
   0x5   : > { %s24_s17 = sadd.s32 1, %s490_s13  ;;  %s90_s18 = sadd.s32 1, %s482_s11 }
   0x6   : > { %p25_p0 = scmp.ge.s32.totalorder %s24_s17, 2  ;;  %p100_p1 = scmp.ne.s32.totalorder %s482_s11, %s478_s10 }
   0x7   : > { %p101_p2 = scmp.eq.s32.totalorder %s345_s15, 1  ;;  %p106_p3 = scmp.ne.s32.totalorder %s478_s10, %s474_s9 }
   0x8   : > { %s639_s17 = smov (%p25_p0, %s24_s17), 0  ;;  %p107_p5 = scmp.eq.s32.totalorder %s346_s16, 1 }
   0x9   : > { %p554_p4 = por %p101_p2, %p100_p1  ;;  %s85_s20 = ssub.s32 %s490_s13, %s639_s17 }
   0xa   : > { %p350_p6 = scmp.ge.s32.totalorder %s494_s14, 1  ;;  %p88_p7 = scmp.eq.s32.totalorder %s85_s20, 0 }
   0xb   : > { %p561_p8 = por %p107_p5, %p106_p3  ;;  %p145_p9 = scmp.lt.s32.totalorder %s494_s14, 3 }
   0xc   : > { %s567_s22 = scalar_select %p88_p7, %s482_s11, %s90_s18  }
   0xd   : > { %p146_p10 = pnand %p350_p6, %p145_p9 }
   0xe   : > { %s496_s25 = smov (!%p146_p10), 4   ;;  %p176_p11 = scmp.lt.s32.totalorder (!%p146_p10), %s486_s12, 1 }
   0xf   : > { %149 = sbr.rel (%p146_p10) target bundleno = 153 (0x99), region = 28  ;;  %s172_s28 = sand.u32 (!%p146_p10), 1, %s478_s10  }
  0x10   : > { %s355_s29 = smul.u32 (!%p146_p10), 40, %s172_s28 }
  0x11   : > { %s357_s6 = smul.u32 (!%p146_p10), 40, %s486_s12 }
  0x12   : > { %s174_s5 = scalar_lea.vmem (!%p146_p10), [#allocation2], %s355_s29 }
  0x13   : > { %s247_s15 = scalar_lea.hbm (!%p146_p10), %s630_s2, %s357_s6  ;;  %s248_s16 = sshll.u32 (!%p146_p10), %s174_s5, 4  ;;  %s249_s16 = int_to_ptr.vmem [resolvable:$true] %s248_s16 }
  0x14   : > { %v195_v0 = vld [vmem:[%s629_s1] sm:$0x1f]  ;;  %s177_s26 = scalar_select %p176_p11, %s486_s12, 1  ;;  %vm221_vm0 = vcmask 31744   ;;  %vm227_vm1 = vcmask 97280  }
  0x15   : > { %v201_v1 = vperm.slane %v195_v0, 0  ;;  %v198_v2 = vrot.slane %v195_v0, 2  ;;  %v200_v3 = vrot.slane %v195_v0, 4  ;;  %v197_v5 = vrot.slane %v195_v0, 1  ;;  %s250_s18 = sshll.u32 %s247_s15, 4  ;;  %s234_s12 = scalar_lea.sflag [#allocation3], %s172_s28  ;;  %s251_s18 = int_to_ptr.hbm [resolvable:$true] %s250_s18 }
  0x16   : > { %v199_v7 = vrot.slane %v195_v0, 3  ;;  %s356_s27 = smul.u32 40, %s177_s26  ;;  %s430_s20 = sshra.s32 %s251_s18, 4  ;;  %s431_s20 = int_to_ptr.hbm [resolvable:$true] %s430_s20 }
  0x17   : > { %206 = vrot.lane.b32.xlu0 %v201_v1, %s496_s25  ;;  %v203_v4 = vperm.slane %v198_v2, 0  ;;  %v205_v6 = vperm.slane %v200_v3, 0  ;;  %v202_v8 = vperm.slane %v197_v5, 0  ;;  %s432_s23 = scalar_lea.hbm %s431_s20, 40  ;;  %s436_s26 = scalar_lea.hbm %s630_s2, 80 }
  0x18   : > { %v204_v9 = vperm.slane %v199_v7, 0  ;;  %s183_s4 = scalar_lea.vmem %s628_s0, %s356_s27  ;;  %p433_p12 = scmp.ne.s32.totalorder %s431_s20, %s432_s23 }
  0x19   : > { %210 = vrot.lane.b32.xlu1 %v203_v4, %s496_s25  ;;  %214 = vrot.lane.b32.xlu2 %v205_v6, %s496_s25  ;;  %v194_v10 = vld [vmem:[%s183_s4 + $0x20] sm:$0xff]  ;;  %v192_v15 = vld [vmem:[%s183_s4 + $0x10] sm:$0xff]  ;;  %p437_p1 = scmp.lt.s32.totalorder %s431_s20, %s630_s2  ;;  %p438_p2 = scmp.lt.s32.totalorder %s436_s26, %s432_s23 }
  0x1a   : > { %v190_v13 = vld [vmem:[%s183_s4] sm:$0xff]  ;;  %v191_v19 = vld [vmem:[%s183_s4 + $0x8] sm:$0xff]  ;;  %v193_v20 = vld [vmem:[%s183_s4 + $0x18] sm:$0xff]  ;;  %p434_p13 = pnand %p433_p12, %p554_p4 }
  0x1b   : > { %p439_p3 = por %p438_p2, %p437_p1 }
  0x1c   : > { %p435_p0 = pneg %p434_p13 }
  0x1e   : > { %p440_p5 = pnand %p439_p3, %p435_p0 }
  0x1f   : > { %208 = vrot.lane.b32.xlu0 %v202_v8, %s496_s25 }
  0x21   : > { %212 = vrot.lane.b32.xlu1 %v204_v9, %s496_s25 }
  0x73   : > { %v215_v11 = vpop.permute.xlu2 %214 }
  0x74   : > { %v226_v12 = vsel %vm221_vm0, %v194_v10, %v215_v11 }
  0x75   : > { %232 = vst.msk [vmem:[%s174_s5 + $0x20] sm:$0xff] %vm227_vm1, %v226_v12 }
  0x89   : > { %v207_v14 = vpop.permute.xlu0 %206 }
  0x8a   : > { %v222_v16 = vsel %vm221_vm0, %v190_v13, %v207_v14 }
  0x8b   : > { %228 = vst.msk [vmem:[%s174_s5] sm:$0xff] %vm227_vm1, %v222_v16  ;;  %v211_v17 = vpop.permute.xlu1 %210 }
  0x8c   : > { %v224_v18 = vsel %vm221_vm0, %v192_v15, %v211_v17 }
  0x8d   : > { %230 = vst.msk [vmem:[%s174_s5 + $0x10] sm:$0xff] %vm227_vm1, %v224_v18 }
  0x91   : > { %v209_v21 = vpop.permute.xlu0 %208 }
  0x92   : > { %v223_v22 = vsel %vm221_vm0, %v191_v19, %v209_v21 }
  0x93   : > { %v213_v23 = vpop.permute.xlu1 %212  ;;  %229 = vst.msk [vmem:[%s174_s5 + $0x8] sm:$0xff] %vm227_vm1, %v223_v22 }
  0x94   : > { %v225_v24 = vsel %vm221_vm0, %v193_v20, %v213_v23 }
  0x95   : > { %231 = vst.msk [vmem:[%s174_s5 + $0x18] sm:$0xff] %vm227_vm1, %v225_v24 }
  0x96   : > { %443 = shalt.err (!%p440_p5)
}
  0x97   : > { %s497_s28 = smov 128   ;;  %s498_s30 = smov 8  }
  0x98   : > { %358 = dma.vmem_to_hbm [thread:$0]  (%p554_p4), %s249_s16, 640, %s251_s18, %s234_s12, %s497_s28, %s497_s28, %s498_s30  }
  0x99 PF: > { %p364_p6 = scmp.ge.s32.totalorder %s494_s14, 2  ;;  %s265_s3 = sand.u32 1, %s474_s9  }
  0x9a   : > { %s266_s4 = scalar_lea.sflag [#allocation3], %s265_s3 }
  0x9b   : > { %p361_p7 = pnand %p364_p6, %p561_p8 }
  0x9d   : > { %p362_p9 = pneg %p361_p7 }
  0x9f   : > { %469 = dma.done.wait (%p362_p9), %s266_s4, 640  }
  0xa0   : > { %471 = vsyncadd (%p362_p9), %s266_s4, 4294966656  ;;  %s15_s14 = sadd.s32 1, %s494_s14   ;;  %s633_s9 = smov %s478_s10 }
  0xa1   : > { %p12_p10 = scmp.ge.s32.totalorder %s15_s14, 4   ;;  %s634_s10 = smov %s482_s11 }
  0xa2   : > { %s635_s11 = smov %s567_s22  ;;  %s636_s12 = smov %s490_s13 }
  0xa3   : > { %s637_s13 = smov %s639_s17  ;;  %14 = sbr.rel (!%p12_p10) target bundleno = 4 (0x4), region = 66 }
  0xa8   :  { %272 = vsyncpa [#allocation3], 1 }
  0xa9   :  { %274 = vsyncpa [#allocation3 + $0x1], 1 }

</bundles_post_ra>
